<compile_context>
chip_gen: v5e
topology: v5e:2x2
jax: 0.10.0
libtpu: 0.0.40
codegen_flags: <defaults>
</compile_context>

<pallas_src>
import math
from functools import partial

import jax
import jax.numpy as jnp
from jax import lax
from jax.experimental import pallas as pl
from jax.experimental.pallas import tpu as pltpu

LN_EPS = 1e-12


def _vmem_limit_bytes():
    # Generation-aware scoped-VMEM limit: 7/8 of physical capacity
    # (v7x 64 MiB -> 56 MiB, v5e/v6e 128 MiB -> 112 MiB).
    try:
        cap = pltpu.get_tpu_info().vmem_capacity_bytes
    except Exception:
        cap = 64 * 1024 * 1024
    return int(cap - cap // 8)


VMEM_LIMIT = _vmem_limit_bytes()


def _const_spec(shape, index_map):
    # Blocks whose index never changes across the grid: request a single
    # pipeline buffer to halve their VMEM footprint.  Fall back silently if
    # the pipeline_mode kwarg / Buffered(1) is unsupported in this jax build.
    try:
        return pl.BlockSpec(shape, index_map, pipeline_mode=pl.Buffered(1))
    except Exception:
        return pl.BlockSpec(shape, index_map)


# ---------------------------------------------------------------------------
# In-kernel math helpers (all f32)
# ---------------------------------------------------------------------------
def _layernorm(x, gamma, beta):
    # PyTorch nn.LayerNorm: biased variance over last dim, eps inside rsqrt.
    mean = jnp.mean(x, axis=-1, keepdims=True)
    xc = x - mean
    var = jnp.mean(xc * xc, axis=-1, keepdims=True)
    return xc * lax.rsqrt(var + LN_EPS) * gamma + beta


_GELU_C = math.sqrt(2.0 / math.pi)


def _gelu(x):
    # TODO(synk): tanh-approx GELU (tanh runs on the EUP) instead of PyTorch's
    # exact-erf nn.GELU(); max abs deviation ~3e-4.
    return 0.5 * x * (1.0 + jnp.tanh(_GELU_C * (x + 0.044715 * x * x * x)))


def _tile(n, target):
    # Largest multiple of 128 that divides n and is <= target; else the full
    # extent (full-dim blocks always satisfy the (8,128) constraint).
    t = min(target, n)
    t -= t % 128
    while t >= 128:
        if n % t == 0:
            return t
        t -= 128
    return n


# ---------------------------------------------------------------------------
# Kernel 1: K/V projection, emitted head-major (B, num_heads, S, head_dim)
# ---------------------------------------------------------------------------
def kv_proj_kernel(num_heads, x_ref, wk_ref, bk_ref, wv_ref, bv_ref,
                   k_ref, v_ref):
    xb = x_ref[0].astype(jnp.bfloat16)                      # (TS, H)
    for h in range(num_heads):                              # static loop
        k_ref[0, h] = (jnp.dot(xb, wk_ref[h],
                               preferred_element_type=jnp.float32)
                       + bk_ref[h]).astype(k_ref.dtype)
        v_ref[0, h] = (jnp.dot(xb, wv_ref[h],
                               preferred_element_type=jnp.float32)
                       + bv_ref[h]).astype(v_ref.dtype)


def run_kv_proj(x, wk, bk, wv, bv, num_heads):
    B, S, H = x.shape
    hd = H // num_heads
    TS = _tile(S, 256)
    x_map = lambda b, s: (b, s, 0)
    kv_map = lambda b, s: (b, 0, s, 0)
    const3 = lambda b, s: (0, 0, 0)
    out_sd = jax.ShapeDtypeStruct((B, num_heads, S, hd), jnp.bfloat16)
    return pl.pallas_call(
        partial(kv_proj_kernel, num_heads),
        out_shape=(out_sd, out_sd),
        grid=(B, S // TS),
        in_specs=[
            pl.BlockSpec((1, TS, H), x_map),
            _const_spec((num_heads, H, hd), const3),   # Wk (bf16, head-major)
            _const_spec((num_heads, 1, hd), const3),   # bk
            _const_spec((num_heads, H, hd), const3),   # Wv
            _const_spec((num_heads, 1, hd), const3),   # bv
        ],
        out_specs=(pl.BlockSpec((1, num_heads, TS, hd), kv_map),
                   pl.BlockSpec((1, num_heads, TS, hd), kv_map)),
        compiler_params=pltpu.CompilerParams(
            dimension_semantics=("parallel", "parallel"),
            vmem_limit_bytes=VMEM_LIMIT),
    )(x, wk, bk, wv, bv)


# ---------------------------------------------------------------------------
# Kernel 2: Q projection + flash-style attention + output projection
#           + residual + LayerNorm.   grid = (B, S/TQ, S/TK)
# ---------------------------------------------------------------------------
def attention_kernel(num_heads,
                     x_ref, wq_ref, bq_ref, k_ref, v_ref, mask_ref,
                     wo_ref, bo_ref, g_ref, bt_ref,
                     out_ref,
                     q_sc, m_sc, l_sc, acc_sc):
    ki = pl.program_id(2)

    @pl.when(ki == 0)
    def _init():
        m_sc[...] = jnp.full_like(m_sc, -1e30)
        l_sc[...] = jnp.zeros_like(l_sc)
        acc_sc[...] = jnp.zeros_like(acc_sc)
        # Q projection: x tile is resident anyway (residual), Wq/bq carry the
        # folded 1/sqrt(head_dim) scale.  Stored head-major in VMEM scratch.
        xb = x_ref[0].astype(jnp.bfloat16)                  # (TQ, H)
        for h in range(num_heads):
            q_sc[h] = (jnp.dot(xb, wq_ref[h],
                               preferred_element_type=jnp.float32)
                       + bq_ref[h]).astype(q_sc.dtype)

    mask = mask_ref[0]                                      # (1, TK) additive

    for h in range(num_heads):                              # static loop
        qh = q_sc[h]                                        # (TQ, hd) bf16
        kh = k_ref[0, h]                                    # (TK, hd) bf16
        vh = v_ref[0, h]                                    # (TK, hd) bf16
        s = lax.dot_general(qh, kh, (((1,), (1,)), ((), ())),
                            preferred_element_type=jnp.float32)  # (TQ, TK)
        s = s + mask
        m_prev = m_sc[h]                                    # (TQ, 1)
        m_new = jnp.maximum(m_prev, jnp.max(s, axis=-1, keepdims=True))
        alpha = jnp.exp(m_prev - m_new)
        p = jnp.exp(s - m_new)                              # f32
        l_sc[h] = alpha * l_sc[h] + jnp.sum(p, axis=-1, keepdims=True)
        # attention-prob dropout: identity (eval semantics)
        acc_sc[h] = alpha * acc_sc[h] + jnp.dot(
            p.astype(jnp.bfloat16), vh, preferred_element_type=jnp.float32)
        m_sc[h] = m_new

    @pl.when(ki == pl.num_programs(2) - 1)
    def _finalize():
        # one full-width normalization of the whole (nh, TQ, hd) accumulator
        ctx = (acc_sc[...] * pl.reciprocal(l_sc[...], approx=True)
               ).astype(jnp.bfloat16)
        # output projection: sum_h ctx_h @ Wo_h  (Wo stored (nh, hd, H))
        attn = jnp.dot(ctx[0], wo_ref[0], preferred_element_type=jnp.float32)
        for h in range(1, num_heads):
            attn = attn + jnp.dot(ctx[h], wo_ref[h],
                                  preferred_element_type=jnp.float32)
        attn = attn + bo_ref[...]
        # residual + LayerNorm (attention_output_dropout is identity)
        out_ref[0] = _layernorm(x_ref[0] + attn, g_ref[...], bt_ref[...])


def run_attention(x, wq, bq, k, v, mask_add, wo, bo, ln_g, ln_b, num_heads):
    B, S, H = x.shape
    hd = H // num_heads
    TQ = _tile(S, 512)          # larger TQ -> fewer K/V re-reads from HBM
    TK = _tile(S, 512)
    x_map = lambda b, qi, ki: (b, qi, 0)
    kv_map = lambda b, qi, ki: (b, 0, ki, 0)
    m_map = lambda b, qi, ki: (b, 0, ki)
    const2 = lambda b, qi, ki: (0, 0)
    const3 = lambda b, qi, ki: (0, 0, 0)
    return pl.pallas_call(
        partial(attention_kernel, num_heads),
        out_shape=jax.ShapeDtypeStruct((B, S, H), jnp.float32),
        grid=(B, S // TQ, S // TK),
        in_specs=[
            pl.BlockSpec((1, TQ, H), x_map),                 # x (Q-proj + residual)
            _const_spec((num_heads, H, hd), const3),         # Wq (scaled, bf16)
            _const_spec((num_heads, 1, hd), const3),         # bq (scaled)
            pl.BlockSpec((1, num_heads, TK, hd), kv_map),    # K head-major
            pl.BlockSpec((1, num_heads, TK, hd), kv_map),    # V head-major
            pl.BlockSpec((1, 1, TK), m_map),                 # additive mask
            _const_spec((num_heads, hd, H), const3),         # Wo head-major
            _const_spec((1, H), const2),                     # bo
            _const_spec((1, H), const2),                     # LN1 gamma
            _const_spec((1, H), const2),                     # LN1 beta
        ],
        out_specs=pl.BlockSpec((1, TQ, H), x_map),
        scratch_shapes=[
            pltpu.VMEM((num_heads, TQ, hd), jnp.bfloat16),   # projected Q
            pltpu.VMEM((num_heads, TQ, 1), jnp.float32),     # running max m
            pltpu.VMEM((num_heads, TQ, 1), jnp.float32),     # running sum l
            pltpu.VMEM((num_heads, TQ, hd), jnp.float32),    # context acc
        ],
        compiler_params=pltpu.CompilerParams(
            dimension_semantics=("parallel", "parallel", "arbitrary"),
            vmem_limit_bytes=VMEM_LIMIT),
    )(x, wq, bq, k, v, mask_add, wo, bo, ln_g, ln_b)


# ---------------------------------------------------------------------------
# Kernel 3: FeedForward (Linear -> GELU -> Linear) + residual + LayerNorm,
#           tiled over the 4H intermediate dim.   grid = (B, S/TS, 4H/TF)
# ---------------------------------------------------------------------------
def ffn_kernel(x_ref, w1_ref, b1_ref, w2_ref, b2_ref, g_ref, bt_ref,
               out_ref, acc_ref):
    f = pl.program_id(2)

    @pl.when(f == 0)
    def _init():
        acc_ref[...] = jnp.zeros_like(acc_ref)

    x = x_ref[0]                                                    # (TS, H) f32
    z = jnp.dot(x.astype(jnp.bfloat16), w1_ref[...],
                preferred_element_type=jnp.float32) + b1_ref[...]   # (TS, TF)
    z = _gelu(z)
    acc_ref[...] += jnp.dot(z.astype(jnp.bfloat16), w2_ref[...],
                            preferred_element_type=jnp.float32)     # (TS, H)

    @pl.when(f == pl.num_programs(2) - 1)
    def _finalize():
        y = acc_ref[...] + b2_ref[...]
        # feed_forward dropout is identity
        out_ref[0] = _layernorm(x + y, g_ref[...], bt_ref[...])


def run_ffn(x, w1, b1, w2, b2, ln_g, ln_b):
    B, S, H = x.shape
    F = 4 * H
    TS = _tile(S, 256)
    TF = _tile(F, 1024)
    x_map = lambda b, s, f: (b, s, 0)
    w1_map = lambda b, s, f: (0, f)
    b1_map = lambda b, s, f: (0, f)
    w2_map = lambda b, s, f: (f, 0)
    const2 = lambda b, s, f: (0, 0)
    return pl.pallas_call(
        ffn_kernel,
        out_shape=jax.ShapeDtypeStruct((B, S, H), jnp.float32),
        grid=(B, S // TS, F // TF),
        in_specs=[
            pl.BlockSpec((1, TS, H), x_map),
            pl.BlockSpec((H, TF), w1_map),
            pl.BlockSpec((1, TF), b1_map),
            pl.BlockSpec((TF, H), w2_map),
            _const_spec((1, H), const2),
            _const_spec((1, H), const2),
            _const_spec((1, H), const2),
        ],
        out_specs=pl.BlockSpec((1, TS, H), x_map),
        scratch_shapes=[pltpu.VMEM((TS, H), jnp.float32)],
        compiler_params=pltpu.CompilerParams(
            dimension_semantics=("parallel", "parallel", "arbitrary"),
            vmem_limit_bytes=VMEM_LIMIT),
    )(x, w1, b1, w2, b2, ln_g, ln_b)


# ---------------------------------------------------------------------------
# Deterministic parameter init (shapes from TransformerModule.__init__)
# ---------------------------------------------------------------------------
def init_transformer_params(key, hidden, num_heads):
    H = hidden
    hd = H // num_heads
    std = 0.02
    ks = jax.random.split(key, 6)

    def lin(k, fin, fout):
        w = jax.random.normal(k, (fin, fout), jnp.float32) * std
        b = jnp.zeros((fout,), jnp.float32)
        return w, b

    wq, bq = lin(ks[0], H, H)
    wk, bk = lin(ks[1], H, H)
    wv, bv = lin(ks[2], H, H)
    wo, bo = lin(ks[3], H, H)
    w1, b1 = lin(ks[4], H, 4 * H)
    w2, b2 = lin(ks[5], 4 * H, H)

    # head-major reshapes:
    #   (H, H)  ->  (num_heads, H, hd)   for Q/K/V (output columns per head)
    #   (H, H)  ->  (num_heads, hd, H)   for the output projection (input rows)
    def head_major_out(w):
        return jnp.transpose(w.reshape(H, num_heads, hd), (1, 0, 2))

    def head_major_bias(b):
        return b.reshape(num_heads, 1, hd)

    # fold 1/sqrt(head_dim) into Wq/bq (scores then need no per-element mul)
    scale = 1.0 / math.sqrt(hd)
    wq_h = (head_major_out(wq) * scale).astype(jnp.bfloat16)
    bq_h = head_major_bias(bq) * scale
    wk_h = head_major_out(wk).astype(jnp.bfloat16)
    bk_h = head_major_bias(bk)
    wv_h = head_major_out(wv).astype(jnp.bfloat16)
    bv_h = head_major_bias(bv)
    wo_h = wo.reshape(num_heads, hd, H).astype(jnp.bfloat16)

    ones = jnp.ones((1, H), jnp.float32)
    zeros = jnp.zeros((1, H), jnp.float32)
    return (wq_h, bq_h, wk_h, bk_h, wv_h, bv_h,
            wo_h, bo.reshape(1, H), ones, zeros,                 # attn + LN1
            w1.astype(jnp.bfloat16), b1.reshape(1, 4 * H),
            w2.astype(jnp.bfloat16), b2.reshape(1, H),
            ones, zeros)                                         # FFN + LN2


# ---------------------------------------------------------------------------
# TransformerModule.forward
# ---------------------------------------------------------------------------
def transformer_forward(params, hidden_states, attn_mask_add, num_heads):
    (wq, bq, wk, bk, wv, bv, wo, bo, ln1g, ln1b,
     w1, b1, w2, b2, ln2g, ln2b) = params
    k, v = run_kv_proj(hidden_states, wk, bk, wv, bv, num_heads)
    h1 = run_attention(hidden_states, wq, bq, k, v, attn_mask_add,
                       wo, bo, ln1g, ln1b, num_heads)
    # TODO(synk): optionally emit h1 as bf16 to halve the inter-kernel HBM
    # traffic (kept f32 here to match reference LayerNorm precision).
    return run_ffn(h1, w1, b1, w2, b2, ln2g, ln2b)


if __name__ == "__main__":
    # Small config consistent with the module: hidden=32, 4 heads, dropout=0
    # (identity).  NOTE: H=32 / S=8 are toy shapes; use H multiple of 128 and
    # S >= 256 for meaningful perf numbers (lane-dense blocks).
    HIDDEN, N_HEADS = 32, 4
    B, S = 2, 8

    key = jax.random.PRNGKey(0)
    pkey, xkey = jax.random.split(key, 2)

    params = init_transformer_params(pkey, HIDDEN, N_HEADS)
    hidden_states = jax.random.normal(xkey, (B, S, HIDDEN), jnp.float32)

    # attention_mask -> additive mask over the key axis, broadcast over the
    # (head, query) dims, exactly like BERT's extended attention mask.
    attention_mask = jnp.ones((B, S), dtype=jnp.int32)
    mask_add = ((1.0 - attention_mask.astype(jnp.float32)) * -10000.0)[:, None, :]

    out = transformer_forward(params, hidden_states, mask_add, N_HEADS)
    jax.block_until_ready(out)
    assert out.shape == (B, S, HIDDEN) and out.dtype == jnp.float32
    print("KERNEL_OK")
</pallas_src>

<mosaic_0001>
module attributes {stable_mosaic.version = 11 : i64} {
  func.func @kv_proj_kernel(%arg0: i32, %arg1: i32, %arg2: memref<1x8x32xf32, #tpu.memory_space<vmem>>, %arg3: memref<4x32x8xbf16, #tpu.memory_space<vmem>>, %arg4: memref<4x1x8xf32, #tpu.memory_space<vmem>>, %arg5: memref<4x32x8xbf16, #tpu.memory_space<vmem>>, %arg6: memref<4x1x8xf32, #tpu.memory_space<vmem>>, %arg7: memref<1x4x8x8xbf16, #tpu.memory_space<vmem>>, %arg8: memref<1x4x8x8xbf16, #tpu.memory_space<vmem>>) attributes {dimension_semantics = [#tpu.dimension_semantics<parallel>, #tpu.dimension_semantics<parallel>], iteration_bounds = array<i64: 2, 1>, scalar_prefetch = 0 : i64, scratch_operands = 0 : i64, tpu.core_type = #tpu.core_type<tc>, window_params = [{transform_indices = @transform_0, window_bounds = array<i64: 1, 8, 32>}, {pipeline_mode = #tpu.pipeline_mode<synchronous>, transform_indices = @transform_1, window_bounds = array<i64: 4, 32, 8>}, {pipeline_mode = #tpu.pipeline_mode<synchronous>, transform_indices = @transform_2, window_bounds = array<i64: 4, 1, 8>}, {pipeline_mode = #tpu.pipeline_mode<synchronous>, transform_indices = @transform_3, window_bounds = array<i64: 4, 32, 8>}, {pipeline_mode = #tpu.pipeline_mode<synchronous>, transform_indices = @transform_4, window_bounds = array<i64: 4, 1, 8>}, {transform_indices = @transform_5, window_bounds = array<i64: 1, 4, 8, 8>}, {transform_indices = @transform_6, window_bounds = array<i64: 1, 4, 8, 8>}]} {
    %c0 = arith.constant 0 : index
    %c0_0 = arith.constant 0 : index
    %c0_1 = arith.constant 0 : index
    %0 = vector.load %arg2[%c0, %c0_0, %c0_1] : memref<1x8x32xf32, #tpu.memory_space<vmem>>, vector<1x8x32xf32>
    %1 = vector.shape_cast %0 : vector<1x8x32xf32> to vector<8x32xf32>
    %2 = arith.truncf %1 : vector<8x32xf32> to vector<8x32xbf16>
    %c0_2 = arith.constant 0 : index
    %c0_3 = arith.constant 0 : index
    %c0_4 = arith.constant 0 : index
    %3 = vector.load %arg3[%c0_2, %c0_3, %c0_4] : memref<4x32x8xbf16, #tpu.memory_space<vmem>>, vector<1x32x8xbf16>
    %4 = vector.shape_cast %3 : vector<1x32x8xbf16> to vector<32x8xbf16>
    %cst = arith.constant dense<0.000000e+00> : vector<8x8xf32>
    %5 = tpu.matmul %2, %4, %cst {dimension_numbers = #tpu.dot_dimension_numbers<[1], [0], [0], [1], [0, 0, 1, 1], [], []>} : vector<8x32xbf16>, vector<32x8xbf16>, vector<8x8xf32> -> vector<8x8xf32>
    %c0_5 = arith.constant 0 : index
    %c0_6 = arith.constant 0 : index
    %c0_7 = arith.constant 0 : index
    %6 = vector.load %arg4[%c0_5, %c0_6, %c0_7] : memref<4x1x8xf32, #tpu.memory_space<vmem>>, vector<1x1x8xf32>
    %7 = vector.shape_cast %6 : vector<1x1x8xf32> to vector<1x8xf32>
    %8 = vector.broadcast %7 : vector<1x8xf32> to vector<8x8xf32>
    %9 = arith.addf %5, %8 : vector<8x8xf32>
    %10 = arith.truncf %9 : vector<8x8xf32> to vector<8x8xbf16>
    %c0_8 = arith.constant 0 : index
    %c0_9 = arith.constant 0 : index
    %c0_10 = arith.constant 0 : index
    %c0_11 = arith.constant 0 : index
    %11 = vector.load %arg7[%c0_8, %c0_9, %c0_10, %c0_11] : memref<1x4x8x8xbf16, #tpu.memory_space<vmem>>, vector<1x1x8x8xbf16>
    %12 = vector.shape_cast %11 : vector<1x1x8x8xbf16> to vector<8x8xbf16>
    %13 = vector.shape_cast %10 : vector<8x8xbf16> to vector<1x1x8x8xbf16>
    tpu.vector_store %arg7[%c0_8, %c0_9, %c0_10, %c0_11], %13 {strides = array<i32>} : memref<1x4x8x8xbf16, #tpu.memory_space<vmem>>, vector<1x1x8x8xbf16>,
    %c0_12 = arith.constant 0 : index
    %c0_13 = arith.constant 0 : index
    %c0_14 = arith.constant 0 : index
    %14 = vector.load %arg5[%c0_12, %c0_13, %c0_14] : memref<4x32x8xbf16, #tpu.memory_space<vmem>>, vector<1x32x8xbf16>
    %15 = vector.shape_cast %14 : vector<1x32x8xbf16> to vector<32x8xbf16>
    %cst_15 = arith.constant dense<0.000000e+00> : vector<8x8xf32>
    %16 = tpu.matmul %2, %15, %cst_15 {dimension_numbers = #tpu.dot_dimension_numbers<[1], [0], [0], [1], [0, 0, 1, 1], [], []>} : vector<8x32xbf16>, vector<32x8xbf16>, vector<8x8xf32> -> vector<8x8xf32>
    %c0_16 = arith.constant 0 : index
    %c0_17 = arith.constant 0 : index
    %c0_18 = arith.constant 0 : index
    %17 = vector.load %arg6[%c0_16, %c0_17, %c0_18] : memref<4x1x8xf32, #tpu.memory_space<vmem>>, vector<1x1x8xf32>
    %18 = vector.shape_cast %17 : vector<1x1x8xf32> to vector<1x8xf32>
    %19 = vector.broadcast %18 : vector<1x8xf32> to vector<8x8xf32>
    %20 = arith.addf %16, %19 : vector<8x8xf32>
    %21 = arith.truncf %20 : vector<8x8xf32> to vector<8x8xbf16>
    %c0_19 = arith.constant 0 : index
    %c0_20 = arith.constant 0 : index
    %c0_21 = arith.constant 0 : index
    %c0_22 = arith.constant 0 : index
    %22 = vector.load %arg8[%c0_19, %c0_20, %c0_21, %c0_22] : memref<1x4x8x8xbf16, #tpu.memory_space<vmem>>, vector<1x1x8x8xbf16>
    %23 = vector.shape_cast %22 : vector<1x1x8x8xbf16> to vector<8x8xbf16>
    %24 = vector.shape_cast %21 : vector<8x8xbf16> to vector<1x1x8x8xbf16>
    tpu.vector_store %arg8[%c0_19, %c0_20, %c0_21, %c0_22], %24 {strides = array<i32>} : memref<1x4x8x8xbf16, #tpu.memory_space<vmem>>, vector<1x1x8x8xbf16>,
    %c1 = arith.constant 1 : index
    %c0_23 = arith.constant 0 : index
    %c0_24 = arith.constant 0 : index
    %25 = vector.load %arg3[%c1, %c0_23, %c0_24] : memref<4x32x8xbf16, #tpu.memory_space<vmem>>, vector<1x32x8xbf16>
    %26 = vector.shape_cast %25 : vector<1x32x8xbf16> to vector<32x8xbf16>
    %cst_25 = arith.constant dense<0.000000e+00> : vector<8x8xf32>
    %27 = tpu.matmul %2, %26, %cst_25 {dimension_numbers = #tpu.dot_dimension_numbers<[1], [0], [0], [1], [0, 0, 1, 1], [], []>} : vector<8x32xbf16>, vector<32x8xbf16>, vector<8x8xf32> -> vector<8x8xf32>
    %c1_26 = arith.constant 1 : index
    %c0_27 = arith.constant 0 : index
    %c0_28 = arith.constant 0 : index
    %28 = vector.load %arg4[%c1_26, %c0_27, %c0_28] : memref<4x1x8xf32, #tpu.memory_space<vmem>>, vector<1x1x8xf32>
    %29 = vector.shape_cast %28 : vector<1x1x8xf32> to vector<1x8xf32>
    %30 = vector.broadcast %29 : vector<1x8xf32> to vector<8x8xf32>
    %31 = arith.addf %27, %30 : vector<8x8xf32>
    %32 = arith.truncf %31 : vector<8x8xf32> to vector<8x8xbf16>
    %c0_29 = arith.constant 0 : index
    %c1_30 = arith.constant 1 : index
    %c0_31 = arith.constant 0 : index
    %c0_32 = arith.constant 0 : index
    %33 = vector.load %arg7[%c0_29, %c1_30, %c0_31, %c0_32] : memref<1x4x8x8xbf16, #tpu.memory_space<vmem>>, vector<1x1x8x8xbf16>
    %34 = vector.shape_cast %33 : vector<1x1x8x8xbf16> to vector<8x8xbf16>
    %35 = vector.shape_cast %32 : vector<8x8xbf16> to vector<1x1x8x8xbf16>
    tpu.vector_store %arg7[%c0_29, %c1_30, %c0_31, %c0_32], %35 {strides = array<i32>} : memref<1x4x8x8xbf16, #tpu.memory_space<vmem>>, vector<1x1x8x8xbf16>,
    %c1_33 = arith.constant 1 : index
    %c0_34 = arith.constant 0 : index
    %c0_35 = arith.constant 0 : index
    %36 = vector.load %arg5[%c1_33, %c0_34, %c0_35] : memref<4x32x8xbf16, #tpu.memory_space<vmem>>, vector<1x32x8xbf16>
    %37 = vector.shape_cast %36 : vector<1x32x8xbf16> to vector<32x8xbf16>
    %cst_36 = arith.constant dense<0.000000e+00> : vector<8x8xf32>
    %38 = tpu.matmul %2, %37, %cst_36 {dimension_numbers = #tpu.dot_dimension_numbers<[1], [0], [0], [1], [0, 0, 1, 1], [], []>} : vector<8x32xbf16>, vector<32x8xbf16>, vector<8x8xf32> -> vector<8x8xf32>
    %c1_37 = arith.constant 1 : index
    %c0_38 = arith.constant 0 : index
    %c0_39 = arith.constant 0 : index
    %39 = vector.load %arg6[%c1_37, %c0_38, %c0_39] : memref<4x1x8xf32, #tpu.memory_space<vmem>>, vector<1x1x8xf32>
    %40 = vector.shape_cast %39 : vector<1x1x8xf32> to vector<1x8xf32>
    %41 = vector.broadcast %40 : vector<1x8xf32> to vector<8x8xf32>
    %42 = arith.addf %38, %41 : vector<8x8xf32>
    %43 = arith.truncf %42 : vector<8x8xf32> to vector<8x8xbf16>
    %c0_40 = arith.constant 0 : index
    %c1_41 = arith.constant 1 : index
    %c0_42 = arith.constant 0 : index
    %c0_43 = arith.constant 0 : index
    %44 = vector.load %arg8[%c0_40, %c1_41, %c0_42, %c0_43] : memref<1x4x8x8xbf16, #tpu.memory_space<vmem>>, vector<1x1x8x8xbf16>
    %45 = vector.shape_cast %44 : vector<1x1x8x8xbf16> to vector<8x8xbf16>
    %46 = vector.shape_cast %43 : vector<8x8xbf16> to vector<1x1x8x8xbf16>
    tpu.vector_store %arg8[%c0_40, %c1_41, %c0_42, %c0_43], %46 {strides = array<i32>} : memref<1x4x8x8xbf16, #tpu.memory_space<vmem>>, vector<1x1x8x8xbf16>,
    %c2 = arith.constant 2 : index
    %c0_44 = arith.constant 0 : index
    %c0_45 = arith.constant 0 : index
    %47 = vector.load %arg3[%c2, %c0_44, %c0_45] : memref<4x32x8xbf16, #tpu.memory_space<vmem>>, vector<1x32x8xbf16>
    %48 = vector.shape_cast %47 : vector<1x32x8xbf16> to vector<32x8xbf16>
    %cst_46 = arith.constant dense<0.000000e+00> : vector<8x8xf32>
    %49 = tpu.matmul %2, %48, %cst_46 {dimension_numbers = #tpu.dot_dimension_numbers<[1], [0], [0], [1], [0, 0, 1, 1], [], []>} : vector<8x32xbf16>, vector<32x8xbf16>, vector<8x8xf32> -> vector<8x8xf32>
    %c2_47 = arith.constant 2 : index
    %c0_48 = arith.constant 0 : index
    %c0_49 = arith.constant 0 : index
    %50 = vector.load %arg4[%c2_47, %c0_48, %c0_49] : memref<4x1x8xf32, #tpu.memory_space<vmem>>, vector<1x1x8xf32>
    %51 = vector.shape_cast %50 : vector<1x1x8xf32> to vector<1x8xf32>
    %52 = vector.broadcast %51 : vector<1x8xf32> to vector<8x8xf32>
    %53 = arith.addf %49, %52 : vector<8x8xf32>
    %54 = arith.truncf %53 : vector<8x8xf32> to vector<8x8xbf16>
    %c0_50 = arith.constant 0 : index
    %c2_51 = arith.constant 2 : index
    %c0_52 = arith.constant 0 : index
    %c0_53 = arith.constant 0 : index
    %55 = vector.load %arg7[%c0_50, %c2_51, %c0_52, %c0_53] : memref<1x4x8x8xbf16, #tpu.memory_space<vmem>>, vector<1x1x8x8xbf16>
    %56 = vector.shape_cast %55 : vector<1x1x8x8xbf16> to vector<8x8xbf16>
    %57 = vector.shape_cast %54 : vector<8x8xbf16> to vector<1x1x8x8xbf16>
    tpu.vector_store %arg7[%c0_50, %c2_51, %c0_52, %c0_53], %57 {strides = array<i32>} : memref<1x4x8x8xbf16, #tpu.memory_space<vmem>>, vector<1x1x8x8xbf16>,
    %c2_54 = arith.constant 2 : index
    %c0_55 = arith.constant 0 : index
    %c0_56 = arith.constant 0 : index
    %58 = vector.load %arg5[%c2_54, %c0_55, %c0_56] : memref<4x32x8xbf16, #tpu.memory_space<vmem>>, vector<1x32x8xbf16>
    %59 = vector.shape_cast %58 : vector<1x32x8xbf16> to vector<32x8xbf16>
    %cst_57 = arith.constant dense<0.000000e+00> : vector<8x8xf32>
    %60 = tpu.matmul %2, %59, %cst_57 {dimension_numbers = #tpu.dot_dimension_numbers<[1], [0], [0], [1], [0, 0, 1, 1], [], []>} : vector<8x32xbf16>, vector<32x8xbf16>, vector<8x8xf32> -> vector<8x8xf32>
    %c2_58 = arith.constant 2 : index
    %c0_59 = arith.constant 0 : index
    %c0_60 = arith.constant 0 : index
    %61 = vector.load %arg6[%c2_58, %c0_59, %c0_60] : memref<4x1x8xf32, #tpu.memory_space<vmem>>, vector<1x1x8xf32>
    %62 = vector.shape_cast %61 : vector<1x1x8xf32> to vector<1x8xf32>
    %63 = vector.broadcast %62 : vector<1x8xf32> to vector<8x8xf32>
    %64 = arith.addf %60, %63 : vector<8x8xf32>
    %65 = arith.truncf %64 : vector<8x8xf32> to vector<8x8xbf16>
    %c0_61 = arith.constant 0 : index
    %c2_62 = arith.constant 2 : index
    %c0_63 = arith.constant 0 : index
    %c0_64 = arith.constant 0 : index
    %66 = vector.load %arg8[%c0_61, %c2_62, %c0_63, %c0_64] : memref<1x4x8x8xbf16, #tpu.memory_space<vmem>>, vector<1x1x8x8xbf16>
    %67 = vector.shape_cast %66 : vector<1x1x8x8xbf16> to vector<8x8xbf16>
    %68 = vector.shape_cast %65 : vector<8x8xbf16> to vector<1x1x8x8xbf16>
    tpu.vector_store %arg8[%c0_61, %c2_62, %c0_63, %c0_64], %68 {strides = array<i32>} : memref<1x4x8x8xbf16, #tpu.memory_space<vmem>>, vector<1x1x8x8xbf16>,
    %c3 = arith.constant 3 : index
    %c0_65 = arith.constant 0 : index
    %c0_66 = arith.constant 0 : index
    %69 = vector.load %arg3[%c3, %c0_65, %c0_66] : memref<4x32x8xbf16, #tpu.memory_space<vmem>>, vector<1x32x8xbf16>
    %70 = vector.shape_cast %69 : vector<1x32x8xbf16> to vector<32x8xbf16>
    %cst_67 = arith.constant dense<0.000000e+00> : vector<8x8xf32>
    %71 = tpu.matmul %2, %70, %cst_67 {dimension_numbers = #tpu.dot_dimension_numbers<[1], [0], [0], [1], [0, 0, 1, 1], [], []>} : vector<8x32xbf16>, vector<32x8xbf16>, vector<8x8xf32> -> vector<8x8xf32>
    %c3_68 = arith.constant 3 : index
    %c0_69 = arith.constant 0 : index
    %c0_70 = arith.constant 0 : index
    %72 = vector.load %arg4[%c3_68, %c0_69, %c0_70] : memref<4x1x8xf32, #tpu.memory_space<vmem>>, vector<1x1x8xf32>
    %73 = vector.shape_cast %72 : vector<1x1x8xf32> to vector<1x8xf32>
    %74 = vector.broadcast %73 : vector<1x8xf32> to vector<8x8xf32>
    %75 = arith.addf %71, %74 : vector<8x8xf32>
    %76 = arith.truncf %75 : vector<8x8xf32> to vector<8x8xbf16>
    %c0_71 = arith.constant 0 : index
    %c3_72 = arith.constant 3 : index
    %c0_73 = arith.constant 0 : index
    %c0_74 = arith.constant 0 : index
    %77 = vector.load %arg7[%c0_71, %c3_72, %c0_73, %c0_74] : memref<1x4x8x8xbf16, #tpu.memory_space<vmem>>, vector<1x1x8x8xbf16>
    %78 = vector.shape_cast %77 : vector<1x1x8x8xbf16> to vector<8x8xbf16>
    %79 = vector.shape_cast %76 : vector<8x8xbf16> to vector<1x1x8x8xbf16>
    tpu.vector_store %arg7[%c0_71, %c3_72, %c0_73, %c0_74], %79 {strides = array<i32>} : memref<1x4x8x8xbf16, #tpu.memory_space<vmem>>, vector<1x1x8x8xbf16>,
    %c3_75 = arith.constant 3 : index
    %c0_76 = arith.constant 0 : index
    %c0_77 = arith.constant 0 : index
    %80 = vector.load %arg5[%c3_75, %c0_76, %c0_77] : memref<4x32x8xbf16, #tpu.memory_space<vmem>>, vector<1x32x8xbf16>
    %81 = vector.shape_cast %80 : vector<1x32x8xbf16> to vector<32x8xbf16>
    %cst_78 = arith.constant dense<0.000000e+00> : vector<8x8xf32>
    %82 = tpu.matmul %2, %81, %cst_78 {dimension_numbers = #tpu.dot_dimension_numbers<[1], [0], [0], [1], [0, 0, 1, 1], [], []>} : vector<8x32xbf16>, vector<32x8xbf16>, vector<8x8xf32> -> vector<8x8xf32>
    %c3_79 = arith.constant 3 : index
    %c0_80 = arith.constant 0 : index
    %c0_81 = arith.constant 0 : index
    %83 = vector.load %arg6[%c3_79, %c0_80, %c0_81] : memref<4x1x8xf32, #tpu.memory_space<vmem>>, vector<1x1x8xf32>
    %84 = vector.shape_cast %83 : vector<1x1x8xf32> to vector<1x8xf32>
    %85 = vector.broadcast %84 : vector<1x8xf32> to vector<8x8xf32>
    %86 = arith.addf %82, %85 : vector<8x8xf32>
    %87 = arith.truncf %86 : vector<8x8xf32> to vector<8x8xbf16>
    %c0_82 = arith.constant 0 : index
    %c3_83 = arith.constant 3 : index
    %c0_84 = arith.constant 0 : index
    %c0_85 = arith.constant 0 : index
    %88 = vector.load %arg8[%c0_82, %c3_83, %c0_84, %c0_85] : memref<1x4x8x8xbf16, #tpu.memory_space<vmem>>, vector<1x1x8x8xbf16>
    %89 = vector.shape_cast %88 : vector<1x1x8x8xbf16> to vector<8x8xbf16>
    %90 = vector.shape_cast %87 : vector<8x8xbf16> to vector<1x1x8x8xbf16>
    tpu.vector_store %arg8[%c0_82, %c3_83, %c0_84, %c0_85], %90 {strides = array<i32>} : memref<1x4x8x8xbf16, #tpu.memory_space<vmem>>, vector<1x1x8x8xbf16>,
    return
  }
  func.func @transform_0(%arg0: i32, %arg1: i32) -> (i32, i32, i32) {
    %c0_i32 = arith.constant 0 : i32
    %c0_i32_0 = arith.constant 0 : i32
    return %arg0, %arg1, %c0_i32 : i32, i32, i32
  }
  func.func @transform_1(%arg0: i32, %arg1: i32) -> (i32, i32, i32) {
    %c0_i32 = arith.constant 0 : i32
    %c0_i32_0 = arith.constant 0 : i32
    %c0_i32_1 = arith.constant 0 : i32
    %c0_i32_2 = arith.constant 0 : i32
    return %c0_i32, %c0_i32_0, %c0_i32_1 : i32, i32, i32
  }
  func.func @transform_2(%arg0: i32, %arg1: i32) -> (i32, i32, i32) {
    %c0_i32 = arith.constant 0 : i32
    %c0_i32_0 = arith.constant 0 : i32
    %c0_i32_1 = arith.constant 0 : i32
    %c0_i32_2 = arith.constant 0 : i32
    return %c0_i32, %c0_i32_0, %c0_i32_1 : i32, i32, i32
  }
  func.func @transform_3(%arg0: i32, %arg1: i32) -> (i32, i32, i32) {
    %c0_i32 = arith.constant 0 : i32
    %c0_i32_0 = arith.constant 0 : i32
    %c0_i32_1 = arith.constant 0 : i32
    %c0_i32_2 = arith.constant 0 : i32
    return %c0_i32, %c0_i32_0, %c0_i32_1 : i32, i32, i32
  }
  func.func @transform_4(%arg0: i32, %arg1: i32) -> (i32, i32, i32) {
    %c0_i32 = arith.constant 0 : i32
    %c0_i32_0 = arith.constant 0 : i32
    %c0_i32_1 = arith.constant 0 : i32
    %c0_i32_2 = arith.constant 0 : i32
    return %c0_i32, %c0_i32_0, %c0_i32_1 : i32, i32, i32
  }
  func.func @transform_5(%arg0: i32, %arg1: i32) -> (i32, i32, i32, i32) {
    %c0_i32 = arith.constant 0 : i32
    %c0_i32_0 = arith.constant 0 : i32
    %c0_i32_1 = arith.constant 0 : i32
    return %arg0, %c0_i32, %arg1, %c0_i32_0 : i32, i32, i32, i32
  }
  func.func @transform_6(%arg0: i32, %arg1: i32) -> (i32, i32, i32, i32) {
    %c0_i32 = arith.constant 0 : i32
    %c0_i32_0 = arith.constant 0 : i32
    %c0_i32_1 = arith.constant 0 : i32
    return %arg0, %c0_i32, %arg1, %c0_i32_0 : i32, i32, i32, i32
  }
}

</mosaic_0001>

<bundles_post_ra>
// kernel: tpu_custom_call.1
= control target key start
LH: loop header
LB: loop body
LE: loop exit
PB: predicated region body
PF: predicated region fallthrough
CT: control target
= control target key end

     0   :  { %s1326_s0 = inlined_call_operand.vmem [shape: f32[2,8,32], index: 0, kind: input, shape index: {}]   ;;  %s1327_s1 = inlined_call_operand.vmem [shape: bf16[4,32,8], index: 1, kind: input, shape index: {}]   ;;  %s1328_s2 = inlined_call_operand.vmem [shape: f32[4,1,8], index: 2, kind: input, shape index: {}]   ;;  %s1329_s3 = inlined_call_operand.vmem [shape: bf16[4,32,8], index: 3, kind: input, shape index: {}]   ;;  %s1330_s4 = inlined_call_operand.vmem [shape: f32[4,1,8], index: 4, kind: input, shape index: {}]   ;;  %s1331_s5 = inlined_call_operand.hbm [shape: bf16[2,4,8,8], index: 5, kind: output, shape index: {0}]   ;;  %s1332_s6 = inlined_call_operand.hbm [shape: bf16[2,4,8,8], index: 6, kind: output, shape index: {1}]  }
   0x1   :  { %1333 = sst [smem:[#allocation8_spill]] %s1326_s0 }
   0x2   :  { %12 = vsyncpa [#allocation3], 0 }
   0x3   :  { %14 = vsyncpa [#allocation3 + $0x1], 0 }
   0x4   :  { %15 = vsyncpa [#allocation5], 0 }
   0x5   :  { %17 = vsyncpa [#allocation5 + $0x1], 0  ;;  %s1102_s21 = smov 0   ;;  %s1104_s22 = smov 0  }
   0x6   :  { %s1106_s23 = smov 0   ;;  %s1108_s24 = smov 0  }
   0x7   :  { %s1110_s25 = smov 0   ;;  %s1112_s26 = smov 0  }
   0x8 LB: > { %s741_s27 = sadd.s32 4294967295, %s1063_s26   ;;  %s742_s28 = sadd.s32 4294967294, %s1063_s26   ;;  %s1063_s26 = sphi %s1112_s26, %s23_s26   ;;  %s1059_s25 = sphi %s1110_s25, %s1341_s25   ;;  %s1055_s24 = sphi %s1108_s24, %s1340_s24   ;;  %s1051_s23 = sphi %s1106_s23, %s1339_s23   ;;  %s1047_s22 = sphi %s1104_s22, %s1338_s22   ;;  %s1043_s21 = sphi %s1102_s21, %s1337_s21  }
   0x9   : > { %s35_s29 = sadd.s32 1, %s1059_s25  ;;  %s156_s30 = sadd.s32 1, %s1051_s23 }
   0xa   : > { %p37_p0 = scmp.ge.s32.totalorder %s35_s29, 2  ;;  %p166_p1 = scmp.ne.s32.totalorder %s1051_s23, %s1047_s22 }
   0xb   : > { %p167_p2 = scmp.eq.s32.totalorder %s741_s27, 1  ;;  %p172_p3 = scmp.ne.s32.totalorder %s1047_s22, %s1043_s21 }
   0xc   : > { %s1343_s29 = smov (%p37_p0, %s35_s29), 0  ;;  %p173_p5 = scmp.eq.s32.totalorder %s742_s28, 1 }
   0xd   : > { %p1142_p4 = por %p167_p2, %p166_p1  ;;  %s151_s8 = ssub.s32 %s1059_s25, %s1343_s29 }
   0xe   : > { %p745_p6 = scmp.ge.s32.totalorder %s1063_s26, 1  ;;  %p154_p7 = scmp.eq.s32.totalorder %s151_s8, 0 }
   0xf   : > { %p1149_p8 = por %p173_p5, %p172_p3  ;;  %p241_p9 = scmp.lt.s32.totalorder %s1063_s26, 3 }
  0x10   : > { %s1155_s10 = scalar_select %p154_p7, %s1051_s23, %s156_s30  }
  0x11   : > { %p242_p10 = pnand %p745_p6, %p241_p9 }
  0x12   : > { %p278_p11 = scmp.lt.s32.totalorder (!%p242_p10), %s1055_s24, 1  ;;  %s1336_s0 = sld [smem:[#allocation8_spill]] (!%p242_p10) }
  0x13   : > { %245 = sbr.rel (%p242_p10) target bundleno = 203 (0xcb), region = 40  ;;  %s1219_s20 = sand.u32 (!%p242_p10), 1, %s1047_s22  }
  0x14   : > { %s746_s12 = sshll.u32 (!%p242_p10), %s1219_s20, 4  ;;  %s881_s8 = sshll.u32 (!%p242_p10), %s1055_s24, 4 }
  0x15   : > { %s1234_s16 = scalar_lea.vmem (!%p242_p10), [#allocation2], %s746_s12  ;;  %s1238_s17 = scalar_lea.vmem (!%p242_p10), [#allocation4], %s746_s12 }
  0x16   : > { %s609_s18 = scalar_lea.hbm (!%p242_p10), %s1331_s5, %s881_s8  ;;  %s610_s28 = sshll.u32 (!%p242_p10), %s1234_s16, 4  ;;  %s611_s28 = int_to_ptr.vmem [resolvable:$true] %s610_s28 }
  0x17   : > { %s612_s11 = sshll.u32 (!%p242_p10), %s609_s18, 4  ;;  %s628_s12 = sshll.u32 (!%p242_p10), %s1238_s17, 4  ;;  %s613_s11 = int_to_ptr.hbm [resolvable:$true] %s612_s11  ;;  %s1271_s12 = int_to_ptr.vmem [resolvable:$true] %s628_s12 }
  0x18   : > { %v866_v0 = vld [vmem:[%s1327_s1 + $0x8] sm:$0xff]  ;;  %v870_v2 = vld [vmem:[%s1327_s1 + $0x18] sm:$0xff]  ;;  %v865_v4 = vld [vmem:[%s1327_s1] sm:$0xff]  ;;  %s279_s30 = scalar_select %p278_p11, %s1055_s24, 1  ;;  %vm308_vm0 = vcmask 261120   ;;  %vm326_vm1 = vcmask 60416  }
  0x19   : > { %v868_v1 = vld [vmem:[%s1329_s3 + $0x8] sm:$0xff]  ;;  %v872_v3 = vld [vmem:[%s1329_s3 + $0x18] sm:$0xff]  ;;  %318 = vmatpush.bf16.msra.mxu0 %v866_v0  ;;  %v867_v5 = vld [vmem:[%s1329_s3] sm:$0xff]  ;;  %391 = vmatpush.bf16.msra.mxu2 %v870_v2  ;;  %s967_s13 = sshra.s32 %s613_s11, 4  ;;  %s973_s24 = scalar_lea.hbm %s1331_s5, 32  ;;  %s968_s13 = int_to_ptr.hbm [resolvable:$true] %s967_s13 }
  0x1a   : > { %354 = vmatpush.bf16.msra.mxu1 %v868_v1  ;;  %429 = vmatpush.bf16.msra.mxu3 %v872_v3  ;;  %v869_v6 = vld [vmem:[%s1327_s1 + $0x10] sm:$0xff]  ;;  %s748_s14 = sshll.u32 %s279_s30, 3  ;;  %v878_v8 = vld [vmem:[%s1327_s1 + $0x38] sm:$0xff]  ;;  %v874_v10 = vld [vmem:[%s1327_s1 + $0x28] sm:$0xff]  ;;  %p974_p1 = scmp.lt.s32.totalorder %s968_s13, %s1331_s5 }
  0x1b   : > { %v871_v7 = vld [vmem:[%s1329_s3 + $0x10] sm:$0xff]  ;;  %v880_v9 = vld [vmem:[%s1329_s3 + $0x38] sm:$0xff]  ;;  %s284_s27 = scalar_lea.vmem %s1336_s0, %s748_s14  ;;  %v876_v11 = vld [vmem:[%s1329_s3 + $0x28] sm:$0xff]  ;;  %s969_s14 = scalar_lea.hbm %s968_s13, 16 }
  0x1c   : > { %v286_v12 = vld [vmem:[%s284_s27] sm:$0xff]  ;;  %v877_v13 = vld [vmem:[%s1327_s1 + $0x30] sm:$0xff]  ;;  %s627_s27 = scalar_lea.hbm %s1332_s6, %s881_s8  ;;  %s592_s8 = scalar_lea.sflag [#allocation3], %s1219_s20 }
  0x1d   : > { %319 = vmatpush.bf16.msra.mxu0 %v865_v4  ;;  %392 = vmatpush.bf16.msra.mxu2 %v869_v6  ;;  %v287_v14 = vpack.c.bf16 %v286_v12, %v286_v12  ;;  %v879_v15 = vld [vmem:[%s1329_s3 + $0x30] sm:$0xff]  ;;  %v873_v16 = vld [vmem:[%s1327_s1 + $0x20] sm:$0xff]  ;;  %s630_s30 = sshll.u32 %s627_s27, 4  ;;  %p970_p12 = scmp.ne.s32.totalorder %s968_s13, %s969_s14  ;;  %s1275_s30 = int_to_ptr.hbm [resolvable:$true] %s630_s30 }
  0x1e   : > { %355 = vmatpush.bf16.msra.mxu1 %v867_v5  ;;  %430 = vmatpush.bf16.msra.mxu3 %v871_v7  ;;  %v875_v17 = vld [vmem:[%s1329_s3 + $0x20] sm:$0xff]  ;;  %p975_p2 = scmp.lt.s32.totalorder %s973_s24, %s969_s14 }
  0x1f   : > { %v945_v18 = vld [vmem:[%s1328_s2] ss:$0 sm:$0xff]  ;;  %v947_v26 = vld [vmem:[%s1328_s2 + $0x1] ss:$0 sm:$0xff]  ;;  %v949_v36 = vld [vmem:[%s1328_s2 + $0x2] ss:$0 sm:$0xff]  ;;  %p971_p13 = pnand %p970_p12, %p1142_p4 }
  0x20   : > { %757 = vmatmul.msk.bf16.vlgmr.msra.gmra.mxu0 %vm308_vm0, %v287_v14  ;;  %780 = vmatmul.msk.bf16.vlgmr.msra.gmra.mxu2 %vm308_vm0, %v287_v14  ;;  %v946_v19 = vld [vmem:[%s1330_s4] ss:$0 sm:$0xff]  ;;  %v948_v27 = vld [vmem:[%s1330_s4 + $0x1] ss:$0 sm:$0xff]  ;;  %v950_v37 = vld [vmem:[%s1330_s4 + $0x2] ss:$0 sm:$0xff]  ;;  %p976_p3 = por %p975_p2, %p974_p1 }
  0x21   : > { %543 = vmatpush.bf16.msrb.mxu2 %v878_v8  ;;  %766 = vmatmul.msk.bf16.vlgmr.msra.gmra.mxu1 %vm308_vm0, %v287_v14  ;;  %v951_v46 = vld [vmem:[%s1328_s2 + $0x3] ss:$0 sm:$0xff]  ;;  %p972_p0 = pneg %p971_p13 }
  0x22   : > { %581 = vmatpush.bf16.msrb.mxu3 %v880_v9  ;;  %467 = vmatpush.bf16.msrb.mxu0 %v874_v10  ;;  %v952_v47 = vld [vmem:[%s1330_s4 + $0x3] ss:$0 sm:$0xff] }
  0x23   : > { %795 = vmatmul.msk.bf16.vlgmr.msra.gmra.mxu3 %vm308_vm0, %v287_v14  ;;  %505 = vmatpush.bf16.msrb.mxu1 %v876_v11  ;;  %p977_p5 = pnand %p976_p3, %p972_p0 }
  0x25   : > { %544 = vmatpush.bf16.msrb.mxu2 %v877_v13 }
  0x26   : > { %582 = vmatpush.bf16.msrb.mxu3 %v879_v15  ;;  %468 = vmatpush.bf16.msrb.mxu0 %v873_v16 }
  0x27   : > { %506 = vmatpush.bf16.msrb.mxu1 %v875_v17 }
  0x30   : > { %810 = vmatmul.msk.bf16.vlgmr.msrb.gmra.mxu0 %vm308_vm0, %v287_v14  ;;  %840 = vmatmul.msk.bf16.vlgmr.msrb.gmra.mxu2 %vm308_vm0, %v287_v14 }
  0x31   : > { %825 = vmatmul.msk.bf16.vlgmr.msrb.gmra.mxu1 %vm308_vm0, %v287_v14 }
  0x33   : > { %855 = vmatmul.msk.bf16.vlgmr.msrb.gmra.mxu3 %vm308_vm0, %v287_v14 }
  0x9d   : > { %v321_v20 = vpop.f32.mrf.mxu0 }
  0x9e   : > { %v357_v21 = vpop.f32.mrf.mxu1  ;;  %v322_v22 = vadd.f32 %v945_v18, %v321_v20 }
  0x9f   : > { %v358_v23 = vadd.f32 %v946_v19, %v357_v21 }
  0xa0   : > { %v325_v24 = vpack.c.bf16 %v322_v22, %v322_v22 }
  0xa1   : > { %v361_v25 = vpack.c.bf16 %v358_v23, %v358_v23 }
  0xa2   : > { %327 = vst.msk [vmem:[%s1234_s16] sm:$0xf] %vm326_vm1, %v325_v24 }
  0xa3   : > { %362 = vst.msk [vmem:[%s1238_s17] sm:$0xf] %vm326_vm1, %v361_v25  ;;  %v394_v28 = vpop.f32.mrf.mxu2 }
  0xa4   : > { %v395_v30 = vadd.f32 %v947_v26, %v394_v28 }
  0xa5   : > { %v323_v32 = vpop.f32.mrf.mxu0 }
  0xa6   : > { %v432_v29 = vpop.f32.mrf.mxu3  ;;  %v359_v33 = vpop.f32.mrf.mxu1  ;;  %v398_v34 = vpack.c.bf16 %v395_v30, %v395_v30 }
  0xa7   : > { %v433_v31 = vadd.f32 %v948_v27, %v432_v29 }
  0xa8   : > { %781 = vst.msk [vmem:[%s1234_s16 + $0x4] sm:$0xf] %vm326_vm1, %v398_v34 }
  0xa9   : > { %v436_v35 = vpack.c.bf16 %v433_v31, %v433_v31 }
  0xab   : > { %796 = vst.msk [vmem:[%s1238_s17 + $0x4] sm:$0xf] %vm326_vm1, %v436_v35  ;;  %v396_v38 = vpop.f32.mrf.mxu2 }
  0xad   : > { %v470_v40 = vpop.f32.mrf.mxu0 }
  0xae   : > { %v434_v39 = vpop.f32.mrf.mxu3  ;;  %v508_v41 = vpop.f32.mrf.mxu1  ;;  %v471_v42 = vadd.f32 %v949_v36, %v470_v40 }
  0xaf   : > { %v509_v43 = vadd.f32 %v950_v37, %v508_v41 }
  0xb0   : > { %v474_v44 = vpack.c.bf16 %v471_v42, %v471_v42 }
  0xb1   : > { %v512_v45 = vpack.c.bf16 %v509_v43, %v509_v43 }
  0xb2   : > { %811 = vst.msk [vmem:[%s1234_s16 + $0x8] sm:$0xf] %vm326_vm1, %v474_v44 }
  0xb3   : > { %826 = vst.msk [vmem:[%s1238_s17 + $0x8] sm:$0xf] %vm326_vm1, %v512_v45  ;;  %v546_v48 = vpop.f32.mrf.mxu2 }
  0xb4   : > { %v547_v50 = vadd.f32 %v951_v46, %v546_v48 }
  0xb5   : > { %v472_v52 = vpop.f32.mrf.mxu0 }
  0xb6   : > { %v584_v49 = vpop.f32.mrf.mxu3  ;;  %v510_v53 = vpop.f32.mrf.mxu1  ;;  %v550_v54 = vpack.c.bf16 %v547_v50, %v547_v50 }
  0xb7   : > { %v585_v51 = vadd.f32 %v952_v47, %v584_v49 }
  0xb8   : > { %841 = vst.msk [vmem:[%s1234_s16 + $0xc] sm:$0xf] %vm326_vm1, %v550_v54 }
  0xb9   : > { %v588_v55 = vpack.c.bf16 %v585_v51, %v585_v51 }
  0xbb   : > { %856 = vst.msk [vmem:[%s1238_s17 + $0xc] sm:$0xf] %vm326_vm1, %v588_v55 }
  0xbc   : > { %980 = shalt.err (!%p977_p5)
}
  0xbd   : > { %s1065_s16 = smov 64   ;;  %s1066_s17 = smov 4   ;;  %v548_v56 = vpop.f32.mrf.mxu2 }
  0xbe   : > { %883 = dma.vmem_to_hbm [thread:$0]  (%p1142_p4), %s611_s28, 256, %s613_s11, %s592_s8, %s1065_s16, %s1065_s16, %s1066_s17   ;;  %v586_v57 = vpop.f32.mrf.mxu3 }
  0xbf   : > { %s597_s15 = scalar_lea.sflag [#allocation5], %s1219_s20  ;;  %s995_s18 = sshra.s32 %s1275_s30, 4  ;;  %s996_s18 = int_to_ptr.hbm [resolvable:$true] %s995_s18 }
  0xc0   : > { %s997_s0 = scalar_lea.hbm %s996_s18, 16  ;;  %s1001_s24 = scalar_lea.hbm %s1332_s6, 32 }
  0xc1   : > { %p998_p6 = scmp.ne.s32.totalorder %s996_s18, %s997_s0  ;;  %p1002_p10 = scmp.lt.s32.totalorder %s996_s18, %s1332_s6 }
  0xc2   : > { %p1003_p11 = scmp.lt.s32.totalorder %s1001_s24, %s997_s0 }
  0xc3   : > { %p999_p7 = pnand %p998_p6, %p1142_p4 }
  0xc4   : > { %p1004_p12 = por %p1003_p11, %p1002_p10 }
  0xc5   : > { %p1000_p9 = pneg %p999_p7 }
  0xc7   : > { %p1005_p13 = pnand %p1004_p12, %p1000_p9 }
  0xc9   : > { %1008 = shalt.err (!%p1005_p13)
}
  0xca   : > { %884 = dma.vmem_to_hbm [thread:$0]  (%p1142_p4), %s1271_s12, 256, %s1275_s30, %s597_s15, %s1065_s16, %s1065_s16, %s1066_s17  }
  0xcb PF: > { %p894_p0 = scmp.ge.s32.totalorder %s1063_s26, 2  ;;  %s645_s20 = sand.u32 1, %s1043_s21  }
  0xcc   : > { %s646_s28 = scalar_lea.sflag [#allocation3], %s645_s20 }
  0xcd   : > { %p888_p1 = pnand %p894_p0, %p1149_p8 }
  0xcf   : > { %p889_p2 = pneg %p888_p1 }
  0xd1   : > { %1034 = dma.done.wait (%p889_p2), %s646_s28, 256  }
  0xd2   : > { %1036 = vsyncadd (%p889_p2), %s646_s28, 4294967040  ;;  %s656_s0 = scalar_lea.sflag [#allocation5], %s645_s20 }
  0xd3   : > { %1038 = dma.done.wait (%p889_p2), %s656_s0, 256  }
  0xd4   : > { %1040 = vsyncadd (%p889_p2), %s656_s0, 4294967040  ;;  %s23_s26 = sadd.s32 1, %s1063_s26   ;;  %s1337_s21 = smov %s1047_s22 }
  0xd5   : > { %p20_p3 = scmp.ge.s32.totalorder %s23_s26, 4   ;;  %s1338_s22 = smov %s1051_s23 }
  0xd6   : > { %s1339_s23 = smov %s1155_s10  ;;  %s1340_s24 = smov %s1059_s25 }
  0xd7   : > { %s1341_s25 = smov %s1343_s29  ;;  %22 = sbr.rel (!%p20_p3) target bundleno = 8 (0x8), region = 110 }
  0xdc   :  { %662 = vsyncpa [#allocation3], 1 }
  0xdd   :  { %664 = vsyncpa [#allocation3 + $0x1], 1 }
  0xde   :  { %665 = vsyncpa [#allocation5], 1 }
  0xdf   :  { %667 = vsyncpa [#allocation5 + $0x1], 1 }

</bundles_post_ra>
